<compile_context>
chip_gen: v7x
topology: tpu7x:2x2x1
jax: 0.10.0
libtpu: 0.0.40
codegen_flags: <defaults>
</compile_context>

<pallas_src>
import functools

import jax
import jax.numpy as jnp
from jax.experimental import pallas as pl
from jax.experimental.pallas import tpu as pltpu


def _round_up(n, m):
    return ((n + m - 1) // m) * m


def _mlp_kernel(x_ref,
                w1_ref, b1_ref,
                w2_ref, b2_ref,
                w3_ref, b3_ref,
                w4_ref, b4_ref,
                o_ref):
    """Fused 4-layer MLP forward for one batch tile. Weights stay VMEM-resident."""
    x = x_ref[...]                      # (TB, in_dim), f32
    tb = x.shape[0]
    in_dim = x.shape[1]
    hidden = w1_ref.shape[1]
    cdt = w2_ref.dtype                  # matmul / MXU dtype (f32 or bf16)

    # ---- layer 1: in_dim is tiny, do it on the VPU (MXU tile would be ~97% padding)
    if in_dim <= 8:
        w1 = w1_ref[...].astype(jnp.float32)        # (in_dim, hidden)
        h = x[:, 0:1].astype(jnp.float32) * w1[0:1, :]
        for k in range(1, in_dim):
            h = h + x[:, k:k+1].astype(jnp.float32) * w1[k:k+1, :]
        h = h + b1_ref[...]
    else:
        h = jnp.dot(x.astype(cdt), w1_ref[...],
                    preferred_element_type=jnp.float32) + b1_ref[...]
    h = jnp.maximum(h, 0.0)

    # ---- layers 2..4 on the MXU, f32 accumulation, f32 bias-add / ReLU
    h = jnp.dot(h.astype(cdt), w2_ref[...],
                preferred_element_type=jnp.float32) + b2_ref[...]
    h = jnp.maximum(h, 0.0)

    h = jnp.dot(h.astype(cdt), w3_ref[...],
                preferred_element_type=jnp.float32) + b3_ref[...]
    h = jnp.maximum(h, 0.0)

    out = jnp.dot(h.astype(cdt), w4_ref[...],
                  preferred_element_type=jnp.float32) + b4_ref[...]
    o_ref[...] = out.astype(o_ref.dtype)            # (TB, padded_out), lane-dense


def policy_network_forward(x, params, *, block_batch=1024,
                           compute_dtype=jnp.float32):
    """Run the fused Pallas MLP kernel.

    x:             [batch, in_dim] float32
    params:        dict with w1..w4 ([in, out] layout) and b1..b4 ([1, out]), f32.
    block_batch:   batch tile size (rows per grid step).
    compute_dtype: dtype of matmul operands (f32 or bf16); accumulation is f32.
    """
    w1, b1 = params["w1"], params["b1"]
    w2, b2 = params["w2"], params["b2"]
    w3, b3 = params["w3"], params["b3"]
    w4, b4 = params["w4"], params["b4"]

    batch, in_dim = x.shape
    out_dim = w4.shape[1]

    # Lane-dense output: pad final width to a multiple of 128 (zeros), slice later.
    padded_out = _round_up(max(out_dim, 128), 128)
    if padded_out != out_dim:
        w4 = jnp.pad(w4, ((0, 0), (0, padded_out - out_dim)))
        b4 = jnp.pad(b4, ((0, 0), (0, padded_out - out_dim)))

    # Batch tile: multiple of 8 sublanes, capped by block_batch; pad batch to fit.
    tb = min(_round_up(block_batch, 8), _round_up(batch, 8))
    padded_batch = _round_up(batch, tb)
    if padded_batch != batch:
        x = jnp.pad(x, ((0, padded_batch - batch), (0, 0)))

    # Cast weights once (wrapper side) for the MXU; biases stay f32.
    cdt = jnp.dtype(compute_dtype)
    if cdt != w1.dtype:
        w1, w2, w3, w4 = (w.astype(cdt) for w in (w1, w2, w3, w4))

    grid = (padded_batch // tb,)

    in_specs = [
        pl.BlockSpec((tb, in_dim), lambda i: (i, 0)),      # x: tiled over batch
        pl.BlockSpec(w1.shape, lambda i: (0, 0)),          # weights/biases: resident
        pl.BlockSpec(b1.shape, lambda i: (0, 0)),
        pl.BlockSpec(w2.shape, lambda i: (0, 0)),
        pl.BlockSpec(b2.shape, lambda i: (0, 0)),
        pl.BlockSpec(w3.shape, lambda i: (0, 0)),
        pl.BlockSpec(b3.shape, lambda i: (0, 0)),
        pl.BlockSpec(w4.shape, lambda i: (0, 0)),
        pl.BlockSpec(b4.shape, lambda i: (0, 0)),
    ]
    out_specs = pl.BlockSpec((tb, padded_out), lambda i: (i, 0))

    out = pl.pallas_call(
        _mlp_kernel,
        out_shape=jax.ShapeDtypeStruct((padded_batch, padded_out), jnp.float32),
        grid=grid,
        in_specs=in_specs,
        out_specs=out_specs,
        compiler_params=pltpu.CompilerParams(
            dimension_semantics=("parallel",)),  # v7x: shard batch over 2 TCs
    )(x, w1, b1, w2, b2, w3, b3, w4, b4)

    return out[:batch, :out_dim]


def init_policy_params(key, in_dim, out_dim, hidden=128):
    """Deterministic init mimicking PyTorch nn.Linear default (U[-1/sqrt(fan_in), +])."""
    dims = [(in_dim, hidden), (hidden, hidden), (hidden, hidden), (hidden, out_dim)]
    params = {}
    keys = jax.random.split(key, 2 * len(dims))
    for i, (fan_in, fan_out) in enumerate(dims):
        bound = 1.0 / jnp.sqrt(jnp.float32(fan_in))
        # Stored as [in, out] (transpose of PyTorch's [out, in]) so the kernel
        # can do x @ W without an in-kernel transpose.
        params[f"w{i+1}"] = jax.random.uniform(
            keys[2 * i], (fan_in, fan_out), jnp.float32, -bound, bound)
        params[f"b{i+1}"] = jax.random.uniform(
            keys[2 * i + 1], (1, fan_out), jnp.float32, -bound, bound)
    return params


def _reference_forward(x, params, compute_dtype=jnp.float32):
    cdt = jnp.dtype(compute_dtype)

    def lin(h, w, b):
        return jnp.dot(h.astype(cdt), w.astype(cdt),
                       preferred_element_type=jnp.float32) + b

    h = jnp.maximum(lin(x, params["w1"], params["b1"]), 0.0)
    h = jnp.maximum(lin(h, params["w2"], params["b2"]), 0.0)
    h = jnp.maximum(lin(h, params["w3"], params["b3"]), 0.0)
    return lin(h, params["w4"], params["b4"])


if __name__ == "__main__":
    key = jax.random.PRNGKey(0)
    k_param, k_x = jax.random.split(key)

    batch, in_dim, out_dim = 8, 4, 2  # CartPole-like state/action dims
    params = init_policy_params(k_param, in_dim, out_dim)
    x = jax.random.normal(k_x, (batch, in_dim), jnp.float32)

    # f32, single-tile path
    logits = policy_network_forward(x, params)
    jax.block_until_ready(logits)
    ref = _reference_forward(x, params)
    assert logits.shape == (batch, out_dim)
    assert jnp.allclose(logits, ref, atol=1e-4, rtol=1e-4), "f32 mismatch vs reference"

    # f32, multi-tile grid + batch-padding path (batch not a multiple of the tile)
    batch2 = 300
    x2 = jax.random.normal(jax.random.PRNGKey(1), (batch2, in_dim), jnp.float32)
    out2 = policy_network_forward(x2, params, block_batch=128)
    jax.block_until_ready(out2)
    ref2 = _reference_forward(x2, params)
    assert out2.shape == (batch2, out_dim)
    assert jnp.allclose(out2, ref2, atol=1e-4, rtol=1e-4), "multi-tile mismatch"

    # bf16 matmul path (f32 accumulation) — v6e/v7x MXU fast path
    out_bf16 = policy_network_forward(x2, params, block_batch=128,
                                      compute_dtype=jnp.bfloat16)
    jax.block_until_ready(out_bf16)
    ref2_bf16 = _reference_forward(x2, params, compute_dtype=jnp.bfloat16)
    assert jnp.allclose(out_bf16, ref2_bf16, atol=5e-2, rtol=5e-2), "bf16 mismatch"

    print("KERNEL_OK")
</pallas_src>

<mosaic_0001>
module attributes {stable_mosaic.version = 11 : i64} {
  func.func @_mlp_kernel(%arg0: i32, %arg1: memref<8x4xf32, #tpu.memory_space<vmem>>, %arg2: memref<4x128xf32, #tpu.memory_space<vmem>>, %arg3: memref<1x128xf32, #tpu.memory_space<vmem>>, %arg4: memref<128x128xf32, #tpu.memory_space<vmem>>, %arg5: memref<1x128xf32, #tpu.memory_space<vmem>>, %arg6: memref<128x128xf32, #tpu.memory_space<vmem>>, %arg7: memref<1x128xf32, #tpu.memory_space<vmem>>, %arg8: memref<128x128xf32, #tpu.memory_space<vmem>>, %arg9: memref<1x128xf32, #tpu.memory_space<vmem>>, %arg10: memref<8x128xf32, #tpu.memory_space<vmem>>) attributes {dimension_semantics = [#tpu.dimension_semantics<parallel>], iteration_bounds = array<i64: 1>, scalar_prefetch = 0 : i64, scratch_operands = 0 : i64, tpu.core_type = #tpu.core_type<tc>, window_params = [{transform_indices = @transform_0, window_bounds = array<i64: 8, 4>}, {pipeline_mode = #tpu.pipeline_mode<synchronous>, transform_indices = @transform_1, window_bounds = array<i64: 4, 128>}, {pipeline_mode = #tpu.pipeline_mode<synchronous>, transform_indices = @transform_2, window_bounds = array<i64: 1, 128>}, {pipeline_mode = #tpu.pipeline_mode<synchronous>, transform_indices = @transform_3, window_bounds = array<i64: 128, 128>}, {pipeline_mode = #tpu.pipeline_mode<synchronous>, transform_indices = @transform_4, window_bounds = array<i64: 1, 128>}, {pipeline_mode = #tpu.pipeline_mode<synchronous>, transform_indices = @transform_5, window_bounds = array<i64: 128, 128>}, {pipeline_mode = #tpu.pipeline_mode<synchronous>, transform_indices = @transform_6, window_bounds = array<i64: 1, 128>}, {pipeline_mode = #tpu.pipeline_mode<synchronous>, transform_indices = @transform_7, window_bounds = array<i64: 128, 128>}, {pipeline_mode = #tpu.pipeline_mode<synchronous>, transform_indices = @transform_8, window_bounds = array<i64: 1, 128>}, {transform_indices = @transform_9, window_bounds = array<i64: 8, 128>}]} {
    %c0 = arith.constant 0 : index
    %c0_0 = arith.constant 0 : index
    %0 = vector.load %arg1[%c0, %c0_0] : memref<8x4xf32, #tpu.memory_space<vmem>>, vector<8x4xf32>
    %c0_1 = arith.constant 0 : index
    %c0_2 = arith.constant 0 : index
    %1 = vector.load %arg2[%c0_1, %c0_2] : memref<4x128xf32, #tpu.memory_space<vmem>>, vector<4x128xf32>
    %2 = vector.extract_strided_slice %0 {offsets = [0, 0], sizes = [8, 1], strides = [1, 1]} : vector<8x4xf32> to vector<8x1xf32>
    %3 = vector.extract_strided_slice %1 {offsets = [0, 0], sizes = [1, 128], strides = [1, 1]} : vector<4x128xf32> to vector<1x128xf32>
    %4 = vector.broadcast %2 : vector<8x1xf32> to vector<8x128xf32>
    %5 = vector.broadcast %3 : vector<1x128xf32> to vector<8x128xf32>
    %6 = arith.mulf %4, %5 : vector<8x128xf32>
    %7 = vector.extract_strided_slice %0 {offsets = [0, 1], sizes = [8, 1], strides = [1, 1]} : vector<8x4xf32> to vector<8x1xf32>
    %8 = vector.extract_strided_slice %1 {offsets = [1, 0], sizes = [1, 128], strides = [1, 1]} : vector<4x128xf32> to vector<1x128xf32>
    %9 = vector.broadcast %7 : vector<8x1xf32> to vector<8x128xf32>
    %10 = vector.broadcast %8 : vector<1x128xf32> to vector<8x128xf32>
    %11 = arith.mulf %9, %10 : vector<8x128xf32>
    %12 = arith.addf %6, %11 : vector<8x128xf32>
    %13 = vector.extract_strided_slice %0 {offsets = [0, 2], sizes = [8, 1], strides = [1, 1]} : vector<8x4xf32> to vector<8x1xf32>
    %14 = vector.extract_strided_slice %1 {offsets = [2, 0], sizes = [1, 128], strides = [1, 1]} : vector<4x128xf32> to vector<1x128xf32>
    %15 = vector.broadcast %13 : vector<8x1xf32> to vector<8x128xf32>
    %16 = vector.broadcast %14 : vector<1x128xf32> to vector<8x128xf32>
    %17 = arith.mulf %15, %16 : vector<8x128xf32>
    %18 = arith.addf %12, %17 : vector<8x128xf32>
    %19 = vector.extract_strided_slice %0 {offsets = [0, 3], sizes = [8, 1], strides = [1, 1]} : vector<8x4xf32> to vector<8x1xf32>
    %20 = vector.extract_strided_slice %1 {offsets = [3, 0], sizes = [1, 128], strides = [1, 1]} : vector<4x128xf32> to vector<1x128xf32>
    %21 = vector.broadcast %19 : vector<8x1xf32> to vector<8x128xf32>
    %22 = vector.broadcast %20 : vector<1x128xf32> to vector<8x128xf32>
    %23 = arith.mulf %21, %22 : vector<8x128xf32>
    %24 = arith.addf %18, %23 : vector<8x128xf32>
    %c0_3 = arith.constant 0 : index
    %c0_4 = arith.constant 0 : index
    %25 = vector.load %arg3[%c0_3, %c0_4] : memref<1x128xf32, #tpu.memory_space<vmem>>, vector<1x128xf32>
    %26 = vector.broadcast %25 : vector<1x128xf32> to vector<8x128xf32>
    %27 = arith.addf %24, %26 : vector<8x128xf32>
    %cst = arith.constant 0.000000e+00 : f32
    %28 = vector.broadcast %cst : f32 to vector<8x128xf32>
    %29 = arith.maximumf %27, %28 : vector<8x128xf32>
    %c0_5 = arith.constant 0 : index
    %c0_6 = arith.constant 0 : index
    %30 = vector.load %arg4[%c0_5, %c0_6] : memref<128x128xf32, #tpu.memory_space<vmem>>, vector<128x128xf32>
    %cst_7 = arith.constant dense<0.000000e+00> : vector<8x128xf32>
    %31 = tpu.matmul %29, %30, %cst_7 {dimension_numbers = #tpu.dot_dimension_numbers<[1], [0], [0], [1], [0, 0, 1, 1], [], []>} : vector<8x128xf32>, vector<128x128xf32>, vector<8x128xf32> -> vector<8x128xf32>
    %c0_8 = arith.constant 0 : index
    %c0_9 = arith.constant 0 : index
    %32 = vector.load %arg5[%c0_8, %c0_9] : memref<1x128xf32, #tpu.memory_space<vmem>>, vector<1x128xf32>
    %33 = vector.broadcast %32 : vector<1x128xf32> to vector<8x128xf32>
    %34 = arith.addf %31, %33 : vector<8x128xf32>
    %cst_10 = arith.constant 0.000000e+00 : f32
    %35 = vector.broadcast %cst_10 : f32 to vector<8x128xf32>
    %36 = arith.maximumf %34, %35 : vector<8x128xf32>
    %c0_11 = arith.constant 0 : index
    %c0_12 = arith.constant 0 : index
    %37 = vector.load %arg6[%c0_11, %c0_12] : memref<128x128xf32, #tpu.memory_space<vmem>>, vector<128x128xf32>
    %cst_13 = arith.constant dense<0.000000e+00> : vector<8x128xf32>
    %38 = tpu.matmul %36, %37, %cst_13 {dimension_numbers = #tpu.dot_dimension_numbers<[1], [0], [0], [1], [0, 0, 1, 1], [], []>} : vector<8x128xf32>, vector<128x128xf32>, vector<8x128xf32> -> vector<8x128xf32>
    %c0_14 = arith.constant 0 : index
    %c0_15 = arith.constant 0 : index
    %39 = vector.load %arg7[%c0_14, %c0_15] : memref<1x128xf32, #tpu.memory_space<vmem>>, vector<1x128xf32>
    %40 = vector.broadcast %39 : vector<1x128xf32> to vector<8x128xf32>
    %41 = arith.addf %38, %40 : vector<8x128xf32>
    %cst_16 = arith.constant 0.000000e+00 : f32
    %42 = vector.broadcast %cst_16 : f32 to vector<8x128xf32>
    %43 = arith.maximumf %41, %42 : vector<8x128xf32>
    %c0_17 = arith.constant 0 : index
    %c0_18 = arith.constant 0 : index
    %44 = vector.load %arg8[%c0_17, %c0_18] : memref<128x128xf32, #tpu.memory_space<vmem>>, vector<128x128xf32>
    %cst_19 = arith.constant dense<0.000000e+00> : vector<8x128xf32>
    %45 = tpu.matmul %43, %44, %cst_19 {dimension_numbers = #tpu.dot_dimension_numbers<[1], [0], [0], [1], [0, 0, 1, 1], [], []>} : vector<8x128xf32>, vector<128x128xf32>, vector<8x128xf32> -> vector<8x128xf32>
    %c0_20 = arith.constant 0 : index
    %c0_21 = arith.constant 0 : index
    %46 = vector.load %arg9[%c0_20, %c0_21] : memref<1x128xf32, #tpu.memory_space<vmem>>, vector<1x128xf32>
    %47 = vector.broadcast %46 : vector<1x128xf32> to vector<8x128xf32>
    %48 = arith.addf %45, %47 : vector<8x128xf32>
    %c0_22 = arith.constant 0 : index
    %c0_23 = arith.constant 0 : index
    %49 = vector.load %arg10[%c0_22, %c0_23] : memref<8x128xf32, #tpu.memory_space<vmem>>, vector<8x128xf32>
    tpu.vector_store %arg10[%c0_22, %c0_23], %48 {strides = array<i32>} : memref<8x128xf32, #tpu.memory_space<vmem>>, vector<8x128xf32>,
    return
  }
  func.func @transform_0(%arg0: i32) -> (i32, i32) {
    %c0_i32 = arith.constant 0 : i32
    %c0_i32_0 = arith.constant 0 : i32
    return %arg0, %c0_i32 : i32, i32
  }
  func.func @transform_1(%arg0: i32) -> (i32, i32) {
    %c0_i32 = arith.constant 0 : i32
    %c0_i32_0 = arith.constant 0 : i32
    %c0_i32_1 = arith.constant 0 : i32
    return %c0_i32, %c0_i32_0 : i32, i32
  }
  func.func @transform_2(%arg0: i32) -> (i32, i32) {
    %c0_i32 = arith.constant 0 : i32
    %c0_i32_0 = arith.constant 0 : i32
    %c0_i32_1 = arith.constant 0 : i32
    return %c0_i32, %c0_i32_0 : i32, i32
  }
  func.func @transform_3(%arg0: i32) -> (i32, i32) {
    %c0_i32 = arith.constant 0 : i32
    %c0_i32_0 = arith.constant 0 : i32
    %c0_i32_1 = arith.constant 0 : i32
    return %c0_i32, %c0_i32_0 : i32, i32
  }
  func.func @transform_4(%arg0: i32) -> (i32, i32) {
    %c0_i32 = arith.constant 0 : i32
    %c0_i32_0 = arith.constant 0 : i32
    %c0_i32_1 = arith.constant 0 : i32
    return %c0_i32, %c0_i32_0 : i32, i32
  }
  func.func @transform_5(%arg0: i32) -> (i32, i32) {
    %c0_i32 = arith.constant 0 : i32
    %c0_i32_0 = arith.constant 0 : i32
    %c0_i32_1 = arith.constant 0 : i32
    return %c0_i32, %c0_i32_0 : i32, i32
  }
  func.func @transform_6(%arg0: i32) -> (i32, i32) {
    %c0_i32 = arith.constant 0 : i32
    %c0_i32_0 = arith.constant 0 : i32
    %c0_i32_1 = arith.constant 0 : i32
    return %c0_i32, %c0_i32_0 : i32, i32
  }
  func.func @transform_7(%arg0: i32) -> (i32, i32) {
    %c0_i32 = arith.constant 0 : i32
    %c0_i32_0 = arith.constant 0 : i32
    %c0_i32_1 = arith.constant 0 : i32
    return %c0_i32, %c0_i32_0 : i32, i32
  }
  func.func @transform_8(%arg0: i32) -> (i32, i32) {
    %c0_i32 = arith.constant 0 : i32
    %c0_i32_0 = arith.constant 0 : i32
    %c0_i32_1 = arith.constant 0 : i32
    return %c0_i32, %c0_i32_0 : i32, i32
  }
  func.func @transform_9(%arg0: i32) -> (i32, i32) {
    %c0_i32 = arith.constant 0 : i32
    %c0_i32_0 = arith.constant 0 : i32
    return %arg0, %c0_i32 : i32, i32
  }
}

</mosaic_0001>

<bundles_post_ra>
// kernel: tpu_custom_call.1
= control target key start
LH: loop header
LB: loop body
LE: loop exit
PB: predicated region body
PF: predicated region fallthrough
CT: control target
= control target key end

     0   :  { %14 = vsyncpa [#allocation3], 0  ;;  %s942_s0 = inlined_call_operand.vmem [shape: f32[8,4], index: 0, kind: input, shape index: {}]   ;;  %s943_s1 = inlined_call_operand.vmem [shape: f32[4,128], index: 1, kind: input, shape index: {}]   ;;  %s944_s2 = inlined_call_operand.vmem [shape: f32[1,128], index: 2, kind: input, shape index: {}]   ;;  %s945_s3 = inlined_call_operand.hbm [shape: f32[128,128], index: 3, kind: input, shape index: {}]   ;;  %s946_s4 = inlined_call_operand.vmem [shape: f32[1,128], index: 4, kind: input, shape index: {}]   ;;  %s947_s5 = inlined_call_operand.hbm [shape: f32[128,128], index: 5, kind: input, shape index: {}]   ;;  %s948_s6 = inlined_call_operand.vmem [shape: f32[1,128], index: 6, kind: input, shape index: {}]   ;;  %s949_s7 = inlined_call_operand.hbm [shape: f32[128,128], index: 7, kind: input, shape index: {}]   ;;  %s950_s8 = inlined_call_operand.vmem [shape: f32[1,128], index: 8, kind: input, shape index: {}]   ;;  %s951_s9 = inlined_call_operand.hbm [shape: f32[8,128], index: 9, kind: output, shape index: {}]  }
   0x1   :  { %15 = vsyncpa [#allocation6], 0 }
   0x2   :  { %16 = vsyncpa [#allocation4], 0  ;;  %s767_s30 = smov [#allocation5]   ;;  %s768_s11 = smov [#allocation2]  }
   0x3   :  { %s42_s10 = sshll.u32 %s767_s30, 4  ;;  %s28_s12 = sshll.u32 %s768_s11, 4  ;;  %s43_s10 = int_to_ptr.vmem [resolvable:$true] %s42_s10  ;;  %s830_s12 = int_to_ptr.vmem [resolvable:$true] %s28_s12 }
   0x4   :  { %s673_s15 = scalar_lea.hbm %s947_s5, 2048 }
   0x5   :  { %p674_p0 = scmp.ne.s32.totalorder %s947_s5, %s673_s15  ;;  %p677_p1 = scmp.lt.u32.totalorder %s673_s15, %s947_s5 }
   0x7   :  { %p679_p2 = pnand %p677_p1, %p674_p0 }
   0x9   :  { %682 = shalt.err (!%p679_p2)
}
   0xa   :  { %s683_s20 = scalar_lea.vmem %s43_s10, 2048  ;;  %p688_p4 = scmp.lt.s32.totalorder %s43_s10, %s43_s10 }
   0xb   :  { %p684_p3 = scmp.ne.s32.totalorder %s43_s10, %s683_s20  ;;  %p689_p5 = scmp.lt.s32.totalorder %s683_s20, %s683_s20 }
   0xd   :  { %p690_p6 = por %p689_p5, %p688_p4 }
   0xf   :  { %p691_p7 = pnand %p690_p6, %p684_p3 }
  0x11   :  { %694 = shalt.err (!%p691_p7)
}
  0x12   :  { %s769_s21 = smov 128   ;;  %s770_s22 = smov 8  }
  0x13   :  { %48 = dma.hbm_to_vmem [thread:$0]  %s947_s5, 2048, %s43_s10, [#allocation6], %s769_s21, %s769_s21, %s770_s22  }
  0x14   :  { %s695_s27 = scalar_lea.hbm %s945_s3, 2048 }
  0x15   :  { %p696_p8 = scmp.ne.s32.totalorder %s945_s3, %s695_s27  ;;  %p699_p9 = scmp.lt.u32.totalorder %s695_s27, %s945_s3 }
  0x17   :  { %p701_p10 = pnand %p699_p9, %p696_p8 }
  0x19   :  { %704 = shalt.err (!%p701_p10)
}
  0x1a   :  { %s705_s13 = scalar_lea.vmem %s830_s12, 2048  ;;  %p710_p12 = scmp.lt.s32.totalorder %s830_s12, %s830_s12 }
  0x1b   :  { %p706_p11 = scmp.ne.s32.totalorder %s830_s12, %s705_s13  ;;  %p711_p13 = scmp.lt.s32.totalorder %s705_s13, %s705_s13 }
  0x1d   :  { %p712_p0 = por %p711_p13, %p710_p12 }
  0x1f   :  { %p713_p1 = pnand %p712_p0, %p706_p11 }
  0x21   :  { %716 = shalt.err (!%p713_p1)
}
  0x22   :  { %34 = dma.hbm_to_vmem [thread:$0]  %s945_s3, 2048, %s830_s12, [#allocation3], %s769_s21, %s769_s21, %s770_s22  }
  0x23   :  { %s771_s14 = smov [#allocation7]   ;;  %s717_s18 = scalar_lea.hbm %s949_s7, 2048 }
  0x24   :  { %s56_s15 = sshll.u32 %s771_s14, 4  ;;  %p718_p2 = scmp.ne.s32.totalorder %s949_s7, %s717_s18  ;;  %s57_s15 = int_to_ptr.vmem [resolvable:$true] %s56_s15 }
  0x25   :  { %p721_p3 = scmp.lt.u32.totalorder %s717_s18, %s949_s7 }
  0x27   :  { %p723_p4 = pnand %p721_p3, %p718_p2 }
  0x29   :  { %726 = shalt.err (!%p723_p4)
}
  0x2a   :  { %s727_s25 = scalar_lea.vmem %s57_s15, 2048  ;;  %p732_p6 = scmp.lt.s32.totalorder %s57_s15, %s57_s15 }
  0x2b   :  { %p728_p5 = scmp.ne.s32.totalorder %s57_s15, %s727_s25  ;;  %p733_p7 = scmp.lt.s32.totalorder %s727_s25, %s727_s25 }
  0x2d   :  { %p734_p8 = por %p733_p7, %p732_p6 }
  0x2f   :  { %p735_p9 = pnand %p734_p8, %p728_p5 }
  0x31   :  { %738 = shalt.err (!%p735_p9)
}
  0x32   :  { %62 = dma.hbm_to_vmem [thread:$0]  %s949_s7, 2048, %s57_s15, [#allocation6], %s769_s21, %s769_s21, %s770_s22  }
  0x33   :  { %761 = dma.done.wait [#allocation3], 2048  }
  0x34   :  { %762 = vsyncadd [#allocation3], 4294965248 }
  0x35   :  { %763 = dma.done.wait [#allocation6], 4096  }
  0x36   :  { %764 = vsyncadd [#allocation6], 4294963200  ;;  %v772_v0 = vmov 0   ;;  %v773_v1 = vmov 2   ;;  %v774_v2 = vmov 0.0|0.0   ;;  %v74_v3 = vld [vmem:[%s942_s0] sm:$0xff]  ;;  %v81_v52 = vlaneseq }
  0x37   :  { %668 = vset.pattern.permute.xlu0 %v772_v0  ;;  %670 = vset.pattern.permute.xlu1 %v773_v1  ;;  %v125_v4 = vld [vmem:[#allocation2] sm:$0xff]  ;;  %v126_v5 = vld [vmem:[#allocation2 + $0x8] sm:$0xff]  ;;  %v127_v7 = vld [vmem:[#allocation2 + $0x10] sm:$0xff]  ;;  %v775_v12 = vmov 1   ;;  %v776_v13 = vmov 3   ;;  %vm777_vm0 = vmmov 0  }
  0x38   :  { %583 = vmatprep.subr.bf16.mxu0 %v774_v2  ;;  %607 = vmatprep.subr.bf16.mxu1 %v774_v2  ;;  %v584_v6 = vpack.c.bf16 %v126_v5, %v125_v4  ;;  %v128_v8 = vld [vmem:[#allocation2 + $0x18] sm:$0xff]  ;;  %v129_v10 = vld [vmem:[#allocation2 + $0x20] sm:$0xff]  ;;  %v130_v11 = vld [vmem:[#allocation2 + $0x28] sm:$0xff]  ;;  %v778_v20 = vmov 0.0   ;;  %v82_v53 = vshrl.u32 %v81_v52, 7  ;;  %s779_s11 = smov [#allocation8]  }
  0x39   :  { %78 = vperm.xlu0 %668, %v74_v3   ;;  %97 = vperm.xlu1 %670, %v74_v3   ;;  %v587_v9 = vpack.c.bf16 %v128_v8, %v127_v7  ;;  %v590_v14 = vpack.c.bf16 %v130_v11, %v129_v10  ;;  %v131_v15 = vld [vmem:[#allocation2 + $0x30] sm:$0xff]  ;;  %v132_v16 = vld [vmem:[#allocation2 + $0x38] sm:$0xff]  ;;  %v133_v18 = vld [vmem:[#allocation2 + $0x40] sm:$0xff]  ;;  %s413_s13 = sshll.u32 %s779_s11, 4  ;;  %s414_s13 = int_to_ptr.vmem [resolvable:$true] %s413_s13 }
  0x3a   :  { %585 = vmatpush3.bf16.msra.mxu0 %v584_v6  ;;  %v593_v17 = vpack.c.bf16 %v132_v16, %v131_v15  ;;  %v134_v19 = vld [vmem:[#allocation2 + $0x48] sm:$0xff]  ;;  %510 = vmatprep.mubr.msk.f32.mxu0 %vm777_vm0, %v778_v20  ;;  %v135_v22 = vld [vmem:[#allocation2 + $0x50] sm:$0xff]  ;;  %v136_v23 = vld [vmem:[#allocation2 + $0x58] sm:$0xff]  ;;  %v83_v54 = vsub.s32 0, %v82_v53  ;;  %v92_v55 = vsub.s32 1, %v82_v53  ;;  %v102_v58 = vsub.s32 2, %v82_v53  ;;  %p744_p11 = scmp.lt.s32.totalorder %s414_s13, %s414_s13 }
  0x3b   :  { %586 = vmatprep.subr.bf16.mxu0 %v774_v2  ;;  %545 = vmatprep.mubr.msk.f32.mxu1 %vm777_vm0, %v778_v20  ;;  %v596_v21 = vpack.c.bf16 %v134_v19, %v133_v18  ;;  %v219_v24 = vld [vmem:[#allocation5] sm:$0xff]  ;;  %v220_v25 = vld [vmem:[#allocation5 + $0x8] sm:$0xff]  ;;  %v221_v26 = vld [vmem:[#allocation5 + $0x10] sm:$0xff]  ;;  %v599_v27 = vpack.c.bf16 %v136_v23, %v135_v22  ;;  %v112_v60 = vsub.s32 3, %v82_v53  ;;  %s739_s5 = scalar_lea.vmem %s414_s13, 128 }
  0x3c   :  { %v608_v28 = vpack.c.bf16 %v220_v25, %v219_v24  ;;  %v222_v29 = vld [vmem:[#allocation5 + $0x18] sm:$0xff]  ;;  %v137_v30 = vld [vmem:[#allocation2 + $0x60] sm:$0xff]  ;;  %v138_v31 = vld [vmem:[#allocation2 + $0x68] sm:$0xff]  ;;  %p740_p10 = scmp.ne.s32.totalorder %s414_s13, %s739_s5  ;;  %p745_p12 = scmp.lt.s32.totalorder %s739_s5, %s739_s5 }
  0x3d   :  { %669 = vset.pattern.permute.xlu0 %v775_v12  ;;  %671 = vset.pattern.permute.xlu1 %v776_v13  ;;  %v611_v32 = vpack.c.bf16 %v222_v29, %v221_v26  ;;  %v223_v33 = vld [vmem:[#allocation5 + $0x20] sm:$0xff]  ;;  %v224_v34 = vld [vmem:[#allocation5 + $0x28] sm:$0xff]  ;;  %v602_v35 = vpack.c.bf16 %v138_v31, %v137_v30  ;;  %v139_v36 = vld [vmem:[#allocation2 + $0x70] sm:$0xff] }
  0x3e   :  { %87 = vperm.xlu0 %669, %v74_v3   ;;  %107 = vperm.xlu1 %671, %v74_v3   ;;  %v140_v37 = vld [vmem:[#allocation2 + $0x78] sm:$0xff]  ;;  %v614_v38 = vpack.c.bf16 %v224_v34, %v223_v33  ;;  %v225_v39 = vld [vmem:[#allocation5 + $0x30] sm:$0xff]  ;;  %v227_v43 = vld [vmem:[#allocation5 + $0x40] sm:$0xff]  ;;  %p746_p13 = por %p745_p12, %p744_p11 }
  0x3f   :  { %588 = vmatpush3.bf16.msra.mxu0 %v587_v9  ;;  %609 = vmatpush3.bf16.msra.mxu1 %v608_v28  ;;  %v226_v40 = vld [vmem:[#allocation5 + $0x38] sm:$0xff]  ;;  %v605_v41 = vpack.c.bf16 %v140_v37, %v139_v36  ;;  %v228_v44 = vld [vmem:[#allocation5 + $0x48] sm:$0xff]  ;;  %v229_v46 = vld [vmem:[#allocation5 + $0x50] sm:$0xff] }
  0x40   :  { %589 = vmatprep.subr.bf16.mxu0 %v774_v2  ;;  %610 = vmatprep.subr.bf16.mxu1 %v774_v2  ;;  %v617_v42 = vpack.c.bf16 %v226_v40, %v225_v39  ;;  %v620_v45 = vpack.c.bf16 %v228_v44, %v227_v43  ;;  %v230_v47 = vld [vmem:[#allocation5 + $0x58] sm:$0xff]  ;;  %v231_v49 = vld [vmem:[#allocation5 + $0x60] sm:$0xff]  ;;  %v232_v50 = vld [vmem:[#allocation5 + $0x68] sm:$0xff]  ;;  %p747_p0 = pnand %p746_p13, %p740_p10 }
  0x41   :  { %v623_v48 = vpack.c.bf16 %v230_v47, %v229_v46  ;;  %v626_v51 = vpack.c.bf16 %v232_v50, %v231_v49  ;;  %v75_v56 = vld [vmem:[%s943_s1] sm:$0xf]  ;;  %v234_v15 = vld [vmem:[#allocation5 + $0x78] sm:$0xff]  ;;  %v314_v18 = vld [vmem:[#allocation7 + $0x8] sm:$0xff] }
  0x42   :  { %672 = vset.pattern.permute.xlu0 %v776_v13  ;;  %v84_v61 = vrot.slane %v75_v56, %v83_v54  ;;  %v93_v62 = vrot.slane %v75_v56, %v92_v55  ;;  %v103_v63 = vrot.slane %v75_v56, %v102_v58  ;;  %v113_v0 = vrot.slane %v75_v56, %v112_v60  ;;  %v423_v10 = vld [vmem:[%s944_s2] ss:$0 sm:$0xff]  ;;  %v316_v22 = vld [vmem:[#allocation7 + $0x18] sm:$0xff]  ;;  %v317_v24 = vld [vmem:[#allocation7 + $0x20] sm:$0xff] }
  0x43   :  { %591 = vmatpush3.bf16.msra.mxu0 %v590_v14  ;;  %612 = vmatpush3.bf16.msra.mxu1 %v611_v32  ;;  %v233_v14 = vld [vmem:[#allocation5 + $0x70] sm:$0xff]  ;;  %v318_v25 = vld [vmem:[#allocation7 + $0x28] sm:$0xff]  ;;  %v321_v29 = vld [vmem:[#allocation7 + $0x40] sm:$0xff] }
  0x44   :  { %592 = vmatprep.subr.bf16.mxu0 %v774_v2  ;;  %613 = vmatprep.subr.bf16.mxu1 %v774_v2  ;;  %v629_v16 = vpack.c.bf16 %v234_v15, %v233_v14  ;;  %v315_v19 = vld [vmem:[#allocation7 + $0x10] sm:$0xff]  ;;  %v638_v26 = vpack.c.bf16 %v318_v25, %v317_v24  ;;  %v322_v30 = vld [vmem:[#allocation7 + $0x48] sm:$0xff]  ;;  %v324_v33 = vld [vmem:[#allocation7 + $0x58] sm:$0xff] }
  0x45   :  { %v635_v23 = vpack.c.bf16 %v316_v22, %v315_v19  ;;  %v644_v31 = vpack.c.bf16 %v322_v30, %v321_v29  ;;  %v323_v32 = vld [vmem:[#allocation7 + $0x50] sm:$0xff]  ;;  %v326_v36 = vld [vmem:[#allocation7 + $0x68] sm:$0xff]  ;;  %v328_v44 = vld [vmem:[#allocation7 + $0x78] sm:$0xff] }
  0x46   :  { %v647_v34 = vpack.c.bf16 %v324_v33, %v323_v32  ;;  %v327_v43 = vld [vmem:[#allocation7 + $0x70] sm:$0xff] }
  0x47   :  { %594 = vmatpush3.bf16.msra.mxu0 %v593_v17  ;;  %615 = vmatpush3.bf16.msra.mxu1 %v614_v38  ;;  %v313_v17 = vld [vmem:[#allocation7] sm:$0xff]  ;;  %v424_v38 = vld [vmem:[%s946_s4] ss:$0 sm:$0xff] }
  0x48   :  { %595 = vmatprep.subr.bf16.mxu0 %v774_v2  ;;  %616 = vmatprep.subr.bf16.mxu1 %v774_v2  ;;  %v425_v46 = vld [vmem:[%s948_s6] ss:$0 sm:$0xff] }
  0x49   :  { %v426_v50 = vld [vmem:[%s950_s8] ss:$0 sm:$0xff] }
  0x4b   :  { %597 = vmatpush3.bf16.msra.mxu0 %v596_v21  ;;  %618 = vmatpush3.bf16.msra.mxu1 %v617_v42  ;;  %v632_v21 = vpack.c.bf16 %v314_v18, %v313_v17 }
  0x4c   :  { %598 = vmatprep.subr.bf16.mxu0 %v774_v2  ;;  %619 = vmatprep.subr.bf16.mxu1 %v774_v2 }
  0x4f   :  { %600 = vmatpush3.bf16.msra.mxu0 %v599_v27  ;;  %621 = vmatpush3.bf16.msra.mxu1 %v620_v45  ;;  %v320_v27 = vld [vmem:[#allocation7 + $0x38] sm:$0xff]  ;;  %v653_v45 = vpack.c.bf16 %v328_v44, %v327_v43 }
  0x50   :  { %601 = vmatprep.subr.bf16.mxu0 %v774_v2  ;;  %622 = vmatprep.subr.bf16.mxu1 %v774_v2 }
  0x53   :  { %603 = vmatpush3.bf16.msra.mxu0 %v602_v35  ;;  %624 = vmatpush3.bf16.msra.mxu1 %v623_v48  ;;  %v325_v35 = vld [vmem:[#allocation7 + $0x60] sm:$0xff] }
  0x54   :  { %604 = vmatprep.subr.bf16.mxu0 %v774_v2  ;;  %625 = vmatprep.subr.bf16.mxu1 %v774_v2  ;;  %v650_v37 = vpack.c.bf16 %v326_v36, %v325_v35 }
  0x57   :  { %606 = vmatpush3.bf16.msra.mxu0 %v605_v41  ;;  %627 = vmatpush3.bf16.msra.mxu1 %v626_v51 }
  0x58   :  { %631 = vmatprep.subr.bf16.mxu0 %v774_v2  ;;  %628 = vmatprep.subr.bf16.mxu1 %v774_v2 }
  0x5b   :  { %630 = vmatpush3.bf16.msra.mxu1 %v629_v16 }
  0xb8   :  { %v79_v57 = vpop.permute.xlu0 %78  ;;  %v98_v59 = vpop.permute.xlu1 %97 }
  0xb9   :  { %v85_v4 = vmul.f32 %v84_v61, %v79_v57  ;;  %v104_v6 = vmul.f32 %v103_v63, %v98_v59 }
  0xbd   :  { %v88_v1 = vpop.permute.xlu0 %87  ;;  %v108_v3 = vpop.permute.xlu1 %107 }
  0xbe   :  { %v94_v5 = vmul.f32 %v93_v62, %v88_v1  ;;  %v114_v8 = vmul.f32 %v113_v0, %v108_v3 }
  0xc0   :  { %v95_v7 = vadd.f32 %v94_v5, %v85_v4 }
  0xc2   :  { %v105_v9 = vadd.f32 %v104_v6, %v95_v7 }
  0xc4   :  { %v115_v11 = vadd.f32 %v114_v8, %v105_v9 }
  0xc6   :  { %v123_v12 = vadd.f32 %v423_v10, %v115_v11 }
  0xc8   :  { %v124_v13 = vmax.f32 %v123_v12, 0.0 }
  0xca   :  { %511 = vmatmul.mubr.f32.vlgmr.msra.gmra.mrb[0].mxu0 %v124_v13 }
  0xcb   :  { %580 = vmatprep.mubr.msk.f32.mxu0 %vm777_vm0, %v778_v20  ;;  %633 = vmatpush3.bf16.msra.mxu0 %v632_v21  ;;  %v319_v20 = vld [vmem:[#allocation7 + $0x30] sm:$0xff] }
  0xcc   :  { %634 = vmatprep.subr.bf16.mxu0 %v774_v2  ;;  %v641_v28 = vpack.c.bf16 %v320_v27, %v319_v20 }
  0xcf   :  { %636 = vmatpush3.bf16.msra.mxu0 %v635_v23 }
  0xd0   :  { %637 = vmatprep.subr.bf16.mxu0 %v774_v2 }
  0xd3   :  { %639 = vmatpush3.bf16.msra.mxu0 %v638_v26 }
  0xd4   :  { %640 = vmatprep.subr.bf16.mxu0 %v774_v2 }
  0xd7   :  { %642 = vmatpush3.bf16.msra.mxu0 %v641_v28 }
  0xd8   :  { %643 = vmatprep.subr.bf16.mxu0 %v774_v2 }
  0xdb   :  { %645 = vmatpush3.bf16.msra.mxu0 %v644_v31 }
  0xdc   :  { %646 = vmatprep.subr.bf16.mxu0 %v774_v2 }
  0xdf   :  { %648 = vmatpush3.bf16.msra.mxu0 %v647_v34 }
  0xe0   :  { %649 = vmatprep.subr.bf16.mxu0 %v774_v2 }
  0xe3   :  { %651 = vmatpush3.bf16.msra.mxu0 %v650_v37 }
  0xe4   :  { %652 = vmatprep.subr.bf16.mxu0 %v774_v2 }
  0xe7   :  { %654 = vmatpush3.bf16.msra.mxu0 %v653_v45 }
 0x19d   :  { %v214_v39 = vpop.f32.mrb[0].mxu0 }
 0x19e   :  { %v215_v40 = vadd.f32 %v424_v38, %v214_v39  ;;  %v512_v41 = vpop.f32.mrb[1].mxu0 }
 0x1a0   :  { %v218_v42 = vmax.f32 %v215_v40, 0.0 }
 0x1a2   :  { %546 = vmatmul.mubr.f32.vlgmr.msra.gmra.mrb[0].mxu1 %v218_v42 }
 0x275   :  { %v308_v47 = vpop.f32.mrb[0].mxu1 }
 0x276   :  { %v309_v48 = vadd.f32 %v425_v46, %v308_v47  ;;  %v547_v2 = vpop.f32.mrb[1].mxu1 }
 0x278   :  { %v312_v49 = vmax.f32 %v309_v48, 0.0 }
 0x27a   :  { %581 = vmatmul.mubr.f32.vlgmr.msra.gmra.mrb[2].mxu0 %v312_v49 }
 0x34d   :  { %v402_v51 = vpop.f32.mrb[2].mxu0 }
 0x34e   :  { %v403_v52 = vadd.f32 %v426_v50, %v402_v51  ;;  %v582_v53 = vpop.f32.mrb[3].mxu0 }
 0x350   :  { %406 = vst [vmem:[#allocation8] sm:$0xff] %v403_v52 }
 0x351   :  { %750 = shalt.err (!%p747_p0)
}
 0x352   :  { %s751_s14 = scalar_lea.hbm %s951_s9, 128 }
 0x353   :  { %p752_p1 = scmp.ne.s32.totalorder %s951_s9, %s751_s14  ;;  %p755_p2 = scmp.lt.u32.totalorder %s751_s14, %s951_s9 }
 0x355   :  { %p757_p3 = pnand %p755_p2, %p752_p1 }
 0x357   :  { %760 = shalt.err (!%p757_p3)
}
 0x358   :  { %416 = dma.vmem_to_hbm [thread:$0]  %s414_s13, 128, %s951_s9, [#allocation4]  }
 0x359   :  { %765 = dma.done.wait [#allocation4], 128  }
 0x35a   :  { %766 = vsyncadd [#allocation4], 4294967168 }
 0x35b   :  { %420 = vsyncpa [#allocation3], 1 }
 0x35c   :  { %421 = vsyncpa [#allocation6], 1 }
 0x35d   :  { %422 = vsyncpa [#allocation4], 1 }

</bundles_post_ra>
